<compile_context>
chip_gen: v7x
topology: tpu7x:2x2x1
jax: 0.10.0
libtpu: 0.0.40
codegen_flags: <defaults>
</compile_context>

<pallas_src>
import math

import jax
import jax.numpy as jnp
from jax.experimental import pallas as pl
from jax.experimental.pallas import tpu as pltpu


_LANE = 128          # vreg lane width (last dim)
_SUBLANE = 8         # vreg sublane width (second-to-last dim, f32)
_VMEM_BUDGET = 48 << 20   # conservative resident budget (fits v7x 64 MiB VMEM)


def _round_up(x: int, m: int) -> int:
    return ((x + m - 1) // m) * m


# --------------------------------------------------------------------------
# Kernel
# --------------------------------------------------------------------------
def _make_mlp_kernel(n_layers: int):
    """Fused [Linear -> ReLU]* -> Linear kernel.

    refs = (x, w0, b0, w1, b1, ..., w_{n-1}, b_{n-1}, out).
    x is f32 and cast to bf16 in-kernel; weights are bf16; dots accumulate in
    f32; bias-add and ReLU run in f32; intermediates re-cast to bf16 for MXU.
    """

    def kernel(x_ref, *refs):
        o_ref = refs[-1]
        h = x_ref[...].astype(jnp.bfloat16)                  # in-kernel cast
        for i in range(n_layers):
            w = refs[2 * i][...]                             # bf16 (K[_pad], N_pad)
            b = refs[2 * i + 1][...]                         # f32  (1, N_pad)
            acc = jnp.dot(h, w, preferred_element_type=jnp.float32) + b
            if i < n_layers - 1:
                h = jnp.maximum(acc, 0.0).astype(jnp.bfloat16)   # ReLU, back to MXU dtype
            else:
                h = acc
        o_ref[...] = h.astype(o_ref.dtype)

    return kernel


# --------------------------------------------------------------------------
# Parameters
# --------------------------------------------------------------------------
def prober_init_params(key, embedding: int, arch: str, output_shape):
    """torch.nn.Linear-style init (uniform in [-1/sqrt(fan_in), 1/sqrt(fan_in)]).
    Weights stored (in_features, out_features) so the kernel computes h @ W + b."""
    output_dim = int(math.prod(output_shape))
    arch_list = list(map(int, arch.split('-'))) if arch != '' else []
    f = [embedding] + arch_list + [output_dim]
    params = []
    for i in range(len(f) - 1):
        fan_in, fan_out = f[i], f[i + 1]
        key, kw, kb = jax.random.split(key, 3)
        bound = 1.0 / math.sqrt(fan_in)
        w = jax.random.uniform(kw, (fan_in, fan_out), jnp.float32, -bound, bound)
        b = jax.random.uniform(kb, (1, fan_out), jnp.float32, -bound, bound)
        params.append((w, b))
    return params, output_dim


def prober_prepare_params(params, embedding: int):
    """One-time weight prep (NOT per forward call): pad every hidden/output
    feature dim to a multiple of 128 (lane-dense) and cast weights to bf16.
    Layer-0 input dim stays unpadded so it matches the raw activation `e`.
    Zero-padded K rows / N columns keep the math exact (ReLU(0) = 0)."""
    dims = [embedding] + [w.shape[1] for (w, _) in params]
    dims_p = [embedding] + [_round_up(d, _LANE) for d in dims[1:]]
    prepped = []
    for i, (w, b) in enumerate(params):
        kin, kout = dims[i], dims[i + 1]
        kin_p, kout_p = dims_p[i], dims_p[i + 1]
        w_p = jnp.pad(w, ((0, kin_p - kin), (0, kout_p - kout))).astype(jnp.bfloat16)
        b_p = jnp.pad(b, ((0, 0), (0, kout_p - kout))).astype(jnp.float32)
        prepped.append((w_p, b_p))
    return prepped


# --------------------------------------------------------------------------
# Forward wrapper
# --------------------------------------------------------------------------
def _const_spec(shape):
    """Grid-invariant full-block spec (weights/biases stay resident in VMEM).
    Single-buffered: the block never changes across grid steps, so the default
    double buffer only wastes VMEM (matters on v7x's 64 MiB)."""
    if hasattr(pl, "Buffered"):
        try:
            return pl.BlockSpec(shape, lambda i: (0, 0),
                                pipeline_mode=pl.Buffered(buffer_count=1))
        except TypeError:
            pass
    return pl.BlockSpec(shape, lambda i: (0, 0))


def _pick_batch_tile(B: int, batch_tile: int) -> int:
    """Large tile to amortize per-step overhead / fill MXU rows, but capped so
    v7x's two TensorCores each get >= 2 steps (even total) when B allows."""
    B8 = _round_up(B, _SUBLANE)
    bt = min(_round_up(batch_tile, _SUBLANE), B8)
    for target_steps in (4, 2):
        if B8 >= target_steps * _SUBLANE:
            bt = min(bt, _round_up(pl.cdiv(B8, target_steps), _SUBLANE))
            break
    steps = pl.cdiv(B8, bt)
    if steps > 1 and steps % 2 == 1:          # prefer even step count (megacore)
        bt_even = _round_up(pl.cdiv(B8, steps + 1), _SUBLANE)
        if bt_even >= _SUBLANE and pl.cdiv(B8, bt_even) % 2 == 0:
            bt = bt_even
    return bt


def prober_forward(e, prepped_params, output_dim: int, *, batch_tile: int = 512):
    """Run the Prober MLP with a single fused Pallas kernel.

    e: (batch, embedding) float32 (raw, unpadded -- cast/pad handled in-kernel)
    prepped_params: output of prober_prepare_params
    returns: (batch, output_dim) float32 (reshape to output_shape is caller's
             job, same as the torch module).
    """
    B, E = e.shape
    n_layers = len(prepped_params)
    dims_p = [E] + [w.shape[1] for (w, _) in prepped_params]
    out_pad = dims_p[-1]

    bt = _pick_batch_tile(B, batch_tile)

    # ---- VMEM footprint accounting -------------------------------------
    w_bytes = sum(int(w.size) * w.dtype.itemsize + int(b.size) * b.dtype.itemsize
                  for (w, b) in prepped_params)

    def _tile_bytes(bt_):
        act_in = 2 * bt_ * E * 4                 # f32 input tile, double-buffered
        act_out = 2 * bt_ * out_pad * 2          # bf16 output tile, double-buffered
        acc = 2 * bt_ * max(dims_p) * 4          # in-flight f32 acc + bf16 recast
        return act_in + act_out + acc

    # Shrink the batch tile if tiles + resident weights blow the v7x budget.
    while bt > _SUBLANE and w_bytes + _tile_bytes(bt) > _VMEM_BUDGET:
        bt = max(_SUBLANE, _round_up(bt // 2, _SUBLANE))
    if w_bytes > _VMEM_BUDGET:
        # TODO(synk): weights alone exceed the resident-VMEM budget; add a
        # (batch, N, K)-tiled grid with a VMEM f32 accumulator fallback.
        pass

    vmem_limit = int(min(max((w_bytes + _tile_bytes(bt)) * 3 // 2, 32 << 20),
                         56 << 20))

    # ---- specs ----------------------------------------------------------
    flat_args = [e]
    in_specs = [pl.BlockSpec((bt, E), lambda i: (i, 0))]   # raw f32 activation tile
    for (w_p, b_p) in prepped_params:
        flat_args += [w_p, b_p]
        in_specs += [_const_spec(w_p.shape), _const_spec(b_p.shape)]

    out = pl.pallas_call(
        _make_mlp_kernel(n_layers),
        # bf16 output halves the lane-padded write stream; precision is already
        # bf16-limited upstream.  True columns sliced / upcast outside.
        out_shape=jax.ShapeDtypeStruct((B, out_pad), jnp.bfloat16),
        grid_spec=pl.GridSpec(
            grid=(pl.cdiv(B, bt),),
            in_specs=in_specs,
            out_specs=pl.BlockSpec((bt, out_pad), lambda i: (i, 0)),  # lane-dense
        ),
        compiler_params=pltpu.CompilerParams(
            dimension_semantics=("parallel",),
            vmem_limit_bytes=vmem_limit,
        ),
    )(*flat_args)

    # Strip lane padding; overhanging batch rows (if any) were write-masked by
    # the pipeline, and rows are independent, so no contamination.
    return out[:, :output_dim].astype(jnp.float32)


def prober_forward_ref(e, params):
    """Pure-JAX f32 reference of the same forward pass."""
    h = e
    for i, (w, b) in enumerate(params):
        h = h @ w + b
        if i < len(params) - 1:
            h = jnp.maximum(h, 0.0)
    return h


if __name__ == "__main__":
    # Prober(embedding=32, arch="64-32", output_shape=[2, 2]) -> output_dim = 4
    embedding = 32
    arch = "64-32"
    output_shape = [2, 2]
    batch = 16

    key = jax.random.PRNGKey(0)
    kparams, kx = jax.random.split(key)

    params, output_dim = prober_init_params(kparams, embedding, arch, output_shape)
    prepped = prober_prepare_params(params, embedding)   # one-time pad + bf16 cast
    e = jax.random.normal(kx, (batch, embedding), dtype=jnp.float32)

    out = jax.block_until_ready(prober_forward(e, prepped, output_dim))

    ref = prober_forward_ref(e, params)
    assert out.shape == (batch, output_dim)
    # bf16 MXU inputs + bf16 output with f32 accumulation -> loosened tolerance.
    assert jnp.allclose(out, ref, atol=3e-2, rtol=3e-2), "mismatch vs reference"

    # The torch module returns shape (batch, prod(output_shape)); reshaping to
    # (batch, *output_shape) is left to the caller, exactly as in the reference.
    print("KERNEL_OK")
</pallas_src>

<mosaic_0001>
module attributes {stable_mosaic.version = 11 : i64} {
  func.func @kernel(%arg0: i32, %arg1: memref<8x32xf32, #tpu.memory_space<vmem>>, %arg2: memref<32x128xbf16, #tpu.memory_space<vmem>>, %arg3: memref<1x128xf32, #tpu.memory_space<vmem>>, %arg4: memref<128x128xbf16, #tpu.memory_space<vmem>>, %arg5: memref<1x128xf32, #tpu.memory_space<vmem>>, %arg6: memref<128x128xbf16, #tpu.memory_space<vmem>>, %arg7: memref<1x128xf32, #tpu.memory_space<vmem>>, %arg8: memref<8x128xbf16, #tpu.memory_space<vmem>>) attributes {dimension_semantics = [#tpu.dimension_semantics<parallel>], iteration_bounds = array<i64: 2>, scalar_prefetch = 0 : i64, scratch_operands = 0 : i64, tpu.core_type = #tpu.core_type<tc>, window_params = [{transform_indices = @transform_0, window_bounds = array<i64: 8, 32>}, {pipeline_mode = #tpu.pipeline_mode<synchronous>, transform_indices = @transform_1, window_bounds = array<i64: 32, 128>}, {pipeline_mode = #tpu.pipeline_mode<synchronous>, transform_indices = @transform_2, window_bounds = array<i64: 1, 128>}, {pipeline_mode = #tpu.pipeline_mode<synchronous>, transform_indices = @transform_3, window_bounds = array<i64: 128, 128>}, {pipeline_mode = #tpu.pipeline_mode<synchronous>, transform_indices = @transform_4, window_bounds = array<i64: 1, 128>}, {pipeline_mode = #tpu.pipeline_mode<synchronous>, transform_indices = @transform_5, window_bounds = array<i64: 128, 128>}, {pipeline_mode = #tpu.pipeline_mode<synchronous>, transform_indices = @transform_6, window_bounds = array<i64: 1, 128>}, {transform_indices = @transform_7, window_bounds = array<i64: 8, 128>}]} {
    %c0 = arith.constant 0 : index
    %c0_0 = arith.constant 0 : index
    %0 = vector.load %arg1[%c0, %c0_0] : memref<8x32xf32, #tpu.memory_space<vmem>>, vector<8x32xf32>
    %1 = arith.truncf %0 : vector<8x32xf32> to vector<8x32xbf16>
    %c0_1 = arith.constant 0 : index
    %c0_2 = arith.constant 0 : index
    %2 = vector.load %arg2[%c0_1, %c0_2] : memref<32x128xbf16, #tpu.memory_space<vmem>>, vector<32x128xbf16>
    %c0_3 = arith.constant 0 : index
    %c0_4 = arith.constant 0 : index
    %3 = vector.load %arg3[%c0_3, %c0_4] : memref<1x128xf32, #tpu.memory_space<vmem>>, vector<1x128xf32>
    %cst = arith.constant dense<0.000000e+00> : vector<8x128xf32>
    %4 = tpu.matmul %1, %2, %cst {dimension_numbers = #tpu.dot_dimension_numbers<[1], [0], [0], [1], [0, 0, 1, 1], [], []>} : vector<8x32xbf16>, vector<32x128xbf16>, vector<8x128xf32> -> vector<8x128xf32>
    %5 = vector.broadcast %3 : vector<1x128xf32> to vector<8x128xf32>
    %6 = arith.addf %4, %5 : vector<8x128xf32>
    %cst_5 = arith.constant 0.000000e+00 : f32
    %7 = vector.broadcast %cst_5 : f32 to vector<8x128xf32>
    %8 = arith.maximumf %6, %7 : vector<8x128xf32>
    %9 = arith.truncf %8 : vector<8x128xf32> to vector<8x128xbf16>
    %c0_6 = arith.constant 0 : index
    %c0_7 = arith.constant 0 : index
    %10 = vector.load %arg4[%c0_6, %c0_7] : memref<128x128xbf16, #tpu.memory_space<vmem>>, vector<128x128xbf16>
    %c0_8 = arith.constant 0 : index
    %c0_9 = arith.constant 0 : index
    %11 = vector.load %arg5[%c0_8, %c0_9] : memref<1x128xf32, #tpu.memory_space<vmem>>, vector<1x128xf32>
    %cst_10 = arith.constant dense<0.000000e+00> : vector<8x128xf32>
    %12 = tpu.matmul %9, %10, %cst_10 {dimension_numbers = #tpu.dot_dimension_numbers<[1], [0], [0], [1], [0, 0, 1, 1], [], []>} : vector<8x128xbf16>, vector<128x128xbf16>, vector<8x128xf32> -> vector<8x128xf32>
    %13 = vector.broadcast %11 : vector<1x128xf32> to vector<8x128xf32>
    %14 = arith.addf %12, %13 : vector<8x128xf32>
    %cst_11 = arith.constant 0.000000e+00 : f32
    %15 = vector.broadcast %cst_11 : f32 to vector<8x128xf32>
    %16 = arith.maximumf %14, %15 : vector<8x128xf32>
    %17 = arith.truncf %16 : vector<8x128xf32> to vector<8x128xbf16>
    %c0_12 = arith.constant 0 : index
    %c0_13 = arith.constant 0 : index
    %18 = vector.load %arg6[%c0_12, %c0_13] : memref<128x128xbf16, #tpu.memory_space<vmem>>, vector<128x128xbf16>
    %c0_14 = arith.constant 0 : index
    %c0_15 = arith.constant 0 : index
    %19 = vector.load %arg7[%c0_14, %c0_15] : memref<1x128xf32, #tpu.memory_space<vmem>>, vector<1x128xf32>
    %cst_16 = arith.constant dense<0.000000e+00> : vector<8x128xf32>
    %20 = tpu.matmul %17, %18, %cst_16 {dimension_numbers = #tpu.dot_dimension_numbers<[1], [0], [0], [1], [0, 0, 1, 1], [], []>} : vector<8x128xbf16>, vector<128x128xbf16>, vector<8x128xf32> -> vector<8x128xf32>
    %21 = vector.broadcast %19 : vector<1x128xf32> to vector<8x128xf32>
    %22 = arith.addf %20, %21 : vector<8x128xf32>
    %23 = arith.truncf %22 : vector<8x128xf32> to vector<8x128xbf16>
    %c0_17 = arith.constant 0 : index
    %c0_18 = arith.constant 0 : index
    %24 = vector.load %arg8[%c0_17, %c0_18] : memref<8x128xbf16, #tpu.memory_space<vmem>>, vector<8x128xbf16>
    tpu.vector_store %arg8[%c0_17, %c0_18], %23 {strides = array<i32>} : memref<8x128xbf16, #tpu.memory_space<vmem>>, vector<8x128xbf16>,
    return
  }
  func.func @transform_0(%arg0: i32) -> (i32, i32) {
    %c0_i32 = arith.constant 0 : i32
    %c0_i32_0 = arith.constant 0 : i32
    return %arg0, %c0_i32 : i32, i32
  }
  func.func @transform_1(%arg0: i32) -> (i32, i32) {
    %c0_i32 = arith.constant 0 : i32
    %c0_i32_0 = arith.constant 0 : i32
    %c0_i32_1 = arith.constant 0 : i32
    return %c0_i32, %c0_i32_0 : i32, i32
  }
  func.func @transform_2(%arg0: i32) -> (i32, i32) {
    %c0_i32 = arith.constant 0 : i32
    %c0_i32_0 = arith.constant 0 : i32
    %c0_i32_1 = arith.constant 0 : i32
    return %c0_i32, %c0_i32_0 : i32, i32
  }
  func.func @transform_3(%arg0: i32) -> (i32, i32) {
    %c0_i32 = arith.constant 0 : i32
    %c0_i32_0 = arith.constant 0 : i32
    %c0_i32_1 = arith.constant 0 : i32
    return %c0_i32, %c0_i32_0 : i32, i32
  }
  func.func @transform_4(%arg0: i32) -> (i32, i32) {
    %c0_i32 = arith.constant 0 : i32
    %c0_i32_0 = arith.constant 0 : i32
    %c0_i32_1 = arith.constant 0 : i32
    return %c0_i32, %c0_i32_0 : i32, i32
  }
  func.func @transform_5(%arg0: i32) -> (i32, i32) {
    %c0_i32 = arith.constant 0 : i32
    %c0_i32_0 = arith.constant 0 : i32
    %c0_i32_1 = arith.constant 0 : i32
    return %c0_i32, %c0_i32_0 : i32, i32
  }
  func.func @transform_6(%arg0: i32) -> (i32, i32) {
    %c0_i32 = arith.constant 0 : i32
    %c0_i32_0 = arith.constant 0 : i32
    %c0_i32_1 = arith.constant 0 : i32
    return %c0_i32, %c0_i32_0 : i32, i32
  }
  func.func @transform_7(%arg0: i32) -> (i32, i32) {
    %c0_i32 = arith.constant 0 : i32
    %c0_i32_0 = arith.constant 0 : i32
    return %arg0, %c0_i32 : i32, i32
  }
}

</mosaic_0001>

<bundles_post_ra>
// kernel: tpu_custom_call.1
= control target key start
LH: loop header
LB: loop body
LE: loop exit
PB: predicated region body
PF: predicated region fallthrough
CT: control target
= control target key end

     0   :  { %12 = vsyncpa [#allocation3], 0  ;;  %s1493_s0 = inlined_call_operand.hbm [shape: f32[16,32], index: 0, kind: input, shape index: {}]   ;;  %s1494_s1 = inlined_call_operand.hbm [shape: bf16[32,128], index: 1, kind: input, shape index: {}]   ;;  %s1495_s2 = inlined_call_operand.vmem [shape: f32[1,128], index: 2, kind: input, shape index: {}]   ;;  %s1496_s3 = inlined_call_operand.hbm [shape: bf16[128,128], index: 3, kind: input, shape index: {}]   ;;  %s1497_s4 = inlined_call_operand.vmem [shape: f32[1,128], index: 4, kind: input, shape index: {}]   ;;  %s1498_s5 = inlined_call_operand.hbm [shape: bf16[128,128], index: 5, kind: input, shape index: {}]   ;;  %s1499_s6 = inlined_call_operand.vmem [shape: f32[1,128], index: 6, kind: input, shape index: {}]   ;;  %s1500_s7 = inlined_call_operand.hbm [shape: bf16[16,128], index: 7, kind: output, shape index: {}]  }
   0x1   :  { %14 = vsyncpa [#allocation3 + $0x1], 0 }
   0x2   :  { %15 = vsyncpa [#allocation6], 0 }
   0x3   :  { %16 = vsyncpa [#allocation9], 0 }
   0x4   :  { %17 = vsyncpa [#allocation4], 0 }
   0x5   :  { %19 = vsyncpa [#allocation4 + $0x1], 0  ;;  %s1196_s24 = smov 0   ;;  %s1198_s25 = smov 0  }
   0x6   :  { %s1200_s26 = smov 0   ;;  %s1202_s27 = smov 0  }
   0x7 LB: > { %s1217_s28 = sadd.s32 4294967295, %s1145_s27   ;;  %s749_s29 = sadd.s32 4294967294, %s1145_s27   ;;  %s1145_s27 = sphi %s1202_s27, %s1526_s27   ;;  %s1141_s26 = sphi %s1200_s26, %s1525_s26   ;;  %s1137_s25 = sphi %s1198_s25, %s1524_s25   ;;  %s1133_s24 = sphi %s1196_s24, %s1523_s24  }
   0x8   : > { %p45_p0 = scmp.ne.s32.totalorder %s1137_s25, %s1133_s24  ;;  %p1501_p1 = scmp.eq.s32.totalorder %s1217_s28, 0 }
   0x9   : > { %p201_p3 = scmp.eq.s32.totalorder %s749_s29, 1  ;;  %p750_p5 = scmp.ge.s32.totalorder %s1145_s27, 1 }
   0xa   : > { %p1226_p4 = por %p1501_p1, %p45_p0  ;;  %p208_p7 = scmp.lt.s32.totalorder %s1145_s27, 3 }
   0xb   : > { %p1231_p6 = por %p201_p3, %p45_p0  ;;  %s1147_s10 = smov [#allocation5]  }
   0xc   : > { %s1505_s30 = scalar_select %p1226_p4, 1, 0 }
   0xd   : > { %s1506_s8 = scalar_select %p1231_p6, 1, 0 }
   0xe   : > { %p1236_p8 = pnand %p750_p5, %p208_p7  ;;  %s220_s11 = sshll.u32 %s1147_s10, 4  ;;  %s1240_s11 = int_to_ptr.vmem [resolvable:$true] %s220_s11 }
   0xf   : > { %1507 = sst [smem:[#allocation15_spill]] %s1506_s8  ;;  %s1148_s13 = smov [#allocation7]  }
  0x10   : > { %s1508_s9 = scalar_select %p1236_p8, 1, 0 }
  0x11   : > { %p874_p9 = pneg %p1236_p8  ;;  %s236_s14 = sshll.u32 %s1148_s13, 4  ;;  %s1251_s14 = int_to_ptr.vmem [resolvable:$true] %s236_s14 }
  0x12   : > { %s1149_s15 = smov [#allocation8]   ;;  %s957_s19 = scalar_lea.hbm %s1494_s1, 256 }
  0x13   : > { %p1247_p11 = pnand %p874_p9, %p1501_p1  ;;  %s1253_s16 = sshll.u32 %s1149_s15, 4  ;;  %s253_s16 = int_to_ptr.vmem [resolvable:$true] %s1253_s16 }
  0x14   : > { %p958_p12 = scmp.ne.s32.totalorder %s1494_s1, %s957_s19  ;;  %p964_p5 = scmp.lt.u32.totalorder %s957_s19, %s1494_s1 }
  0x15   : > { %p1263_p13 = pneg %p1247_p11 }
  0x17   : > { %p960_p0 = pnand %p1263_p13, %p958_p12 }
  0x19   : > { %p961_p3 = pneg %p960_p0 }
  0x1b   : > { %p966_p7 = pnand %p964_p5, %p961_p3 }
  0x1d   : > { %969 = shalt.err (!%p966_p7)
}
  0x1e   : > { %s970_s10 = scalar_lea.vmem %s1240_s11, 256  ;;  %p978_p2 = scmp.lt.s32.totalorder %s1240_s11, %s1240_s11 }
  0x1f   : > { %p971_p9 = scmp.ne.s32.totalorder %s1240_s11, %s970_s10  ;;  %p979_p6 = scmp.lt.s32.totalorder %s970_s10, %s970_s10 }
  0x21   : > { %p973_p10 = pnand %p971_p9, %p1263_p13  ;;  %p980_p12 = por %p979_p6, %p978_p2 }
  0x23   : > { %p974_p1 = pneg %p973_p10 }
  0x25   : > { %p981_p0 = pnand %p980_p12, %p974_p1 }
  0x27   : > { %984 = shalt.err (!%p981_p0)
}
  0x28   : > { %s1150_s13 = smov 64   ;;  %s1151_s15 = smov 4  }
  0x29   : > { %877 = dma.hbm_to_vmem [thread:$0]  (!%p1247_p11), %s1494_s1, 256, %s1240_s11, [#allocation6], %s1150_s13, %s1150_s13, %s1151_s15  }
  0x2a   : > { %s985_s21 = scalar_lea.hbm %s1496_s3, 1024 }
  0x2b   : > { %p986_p1 = scmp.ne.s32.totalorder %s1496_s3, %s985_s21  ;;  %p992_p10 = scmp.lt.u32.totalorder %s985_s21, %s1496_s3 }
  0x2d   : > { %p988_p2 = pnand %p986_p1, %p1263_p13 }
  0x2f   : > { %p989_p6 = pneg %p988_p2 }
  0x31   : > { %p994_p3 = pnand %p992_p10, %p989_p6 }
  0x33   : > { %997 = shalt.err (!%p994_p3)
}
  0x34   : > { %s998_s11 = scalar_lea.vmem %s1251_s14, 1024  ;;  %p1006_p12 = scmp.lt.s32.totalorder %s1251_s14, %s1251_s14 }
  0x35   : > { %p999_p5 = scmp.ne.s32.totalorder %s1251_s14, %s998_s11  ;;  %p1007_p0 = scmp.lt.s32.totalorder %s998_s11, %s998_s11 }
  0x37   : > { %p1001_p7 = pnand %p999_p5, %p1263_p13  ;;  %p1008_p1 = por %p1007_p0, %p1006_p12 }
  0x39   : > { %p1002_p9 = pneg %p1001_p7 }
  0x3b   : > { %p1009_p2 = pnand %p1008_p1, %p1002_p9 }
  0x3d   : > { %1012 = shalt.err (!%p1009_p2)
}
  0x3e   : > { %880 = dma.hbm_to_vmem [thread:$0]  (!%p1247_p11), %s1496_s3, 1024, %s1251_s14, [#allocation6], %s1150_s13, %s1150_s13, %s1151_s15  }
  0x3f   : > { %s1013_s20 = scalar_lea.hbm %s1498_s5, 1024 }
  0x40   : > { %p1014_p6 = scmp.ne.s32.totalorder %s1498_s5, %s1013_s20  ;;  %p1020_p5 = scmp.lt.u32.totalorder %s1013_s20, %s1498_s5 }
  0x42   : > { %p1016_p10 = pnand %p1014_p6, %p1263_p13 }
  0x44   : > { %p1017_p3 = pneg %p1016_p10 }
  0x46   : > { %p1022_p7 = pnand %p1020_p5, %p1017_p3 }
  0x48   : > { %1025 = shalt.err (!%p1022_p7)
}
  0x49   : > { %s1026_s11 = scalar_lea.vmem %s253_s16, 1024  ;;  %p1034_p1 = scmp.lt.s32.totalorder %s253_s16, %s253_s16 }
  0x4a   : > { %p1027_p9 = scmp.ne.s32.totalorder %s253_s16, %s1026_s11  ;;  %p1035_p2 = scmp.lt.s32.totalorder %s1026_s11, %s1026_s11 }
  0x4c   : > { %p1029_p12 = pnand %p1027_p9, %p1263_p13  ;;  %p1036_p4 = por %p1035_p2, %p1034_p1 }
  0x4e   : > { %p1030_p0 = pneg %p1029_p12 }
  0x50   : > { %p1037_p8 = pnand %p1036_p4, %p1030_p0 }
  0x52   : > { %1040 = shalt.err (!%p1037_p8)
}
  0x53   : > { %883 = dma.hbm_to_vmem [thread:$0]  (!%p1247_p11), %s1498_s5, 1024, %s253_s16, [#allocation9], %s1150_s13, %s1150_s13, %s1151_s15  }
  0x54   : > { %s1336_s22 = sadd.s32 1, %s1145_s27   ;;  %s32_s17 = sadd.s32 1, %s1141_s26 }
  0x55   : > { %s29_s12 = ssub.s32 %s1145_s27, %s1336_s22  ;;  %p39_p8 = scmp.ne.s32.totalorder %s1141_s26, %s1137_s25 }
  0x56   : > { %p30_p4 = scmp.eq.s32.totalorder %s29_s12, 0  ;;  %p40_p13 = scmp.eq.s32.totalorder %s1145_s27, 0 }
  0x57   : > { %p895_p6 = scmp.lt.s32.totalorder %s1145_s27, 2  ;;  %p1511_p3 = scmp.eq.s32.totalorder %s1217_s28, 1 }
  0x58   : > { %s1346_s18 = scalar_select %p30_p4, %s1141_s26, %s32_s17  }
  0x59   : > { %p41_p10 = por %p40_p13, %p39_p8  ;;  %p1350_p5 = por %p1511_p3, %p39_p8 }
  0x5a   : > { %s269_s20 = sand.u32 1, %s1141_s26   ;;  %s756_s21 = sshll.u32 %s1145_s27, 7 }
  0x5b   : > { %s755_s16 = sshll.u32 %s269_s20, 3  ;;  %s1359_s23 = scalar_lea.hbm %s1493_s0, %s756_s21 }
  0x5c   : > { %s273_s29 = scalar_lea.vmem [#allocation2], %s755_s16  ;;  %p1361_p11 = pnand %p895_p6, %p41_p10 }
  0x5d   : > { %s280_s10 = sshll.u32 %s273_s29, 4  ;;  %s270_s14 = scalar_lea.sflag [#allocation3], %s269_s20  ;;  %s1365_s10 = int_to_ptr.vmem [resolvable:$true] %s280_s10 }
  0x5e   : > { %s1041_s8 = scalar_lea.hbm %s1359_s23, 128  ;;  %p1043_p9 = pneg %p1361_p11 }
  0x5f   : > { %p1042_p7 = scmp.ne.s32.totalorder %s1359_s23, %s1041_s8  ;;  %s1046_s21 = scalar_lea.hbm %s1493_s0, 256 }
  0x60   : > { %p1047_p1 = scmp.lt.u32.totalorder %s1359_s23, %s1493_s0  ;;  %p1048_p2 = scmp.lt.u32.totalorder %s1046_s21, %s1041_s8 }
  0x61   : > { %p1044_p12 = pnand %p1043_p9, %p1042_p7  ;;  %p1050_p8 = scmp.lt.u32.totalorder %s1041_s8, %s1359_s23 }
  0x62   : > { %p1049_p4 = por %p1048_p2, %p1047_p1 }
  0x63   : > { %p1045_p0 = pneg %p1044_p12 }
  0x64   : > { %p1051_p13 = por %p1050_p8, %p1049_p4 }
  0x66   : > { %p1052_p6 = pnand %p1051_p13, %p1045_p0 }
  0x68   : > { %1055 = shalt.err (!%p1052_p6)
}
  0x69   : > { %s1056_s20 = scalar_lea.vmem %s1365_s10, 128  ;;  %s1152_s15 = smov [#allocation2]  }
  0x6a   : > { %p1057_p10 = scmp.ne.s32.totalorder %s1365_s10, %s1056_s20  ;;  %s1061_s29 = sshll.u32 %s1152_s15, 4  ;;  %s1062_s29 = int_to_ptr.vmem [resolvable:$false] %s1061_s29 }
  0x6b   : > { %s1063_s12 = scalar_lea.vmem %s1062_s29, 256  ;;  %p1064_p12 = scmp.lt.s32.totalorder %s1365_s10, %s1062_s29 }
  0x6c   : > { %p1059_p3 = pnand %p1057_p10, %p1043_p9  ;;  %p1065_p1 = scmp.lt.s32.totalorder %s1063_s12, %s1056_s20 }
  0x6e   : > { %p1060_p7 = pneg %p1059_p3  ;;  %p1066_p2 = por %p1065_p1, %p1064_p12 }
  0x70   : > { %p1067_p4 = pnand %p1066_p2, %p1060_p7 }
  0x72   : > { %1070 = shalt.err (!%p1067_p4)
}
  0x73   : > { %887 = dma.hbm_to_vmem [thread:$0]  (!%p1361_p11), %s1359_s23, 128, %s1365_s10, %s270_s14  }
  0x74   : > { %p1514_p0 = scmp.ne.s32.totalorder %s1508_s9, 0 }
  0x75   : > { %s1395_s8 = sand.u32 (!%p1514_p0), 1, %s1137_s25   ;;  %p1515_p9 = scmp.ne.s32.totalorder (!%p1514_p0), %s1505_s30, 0 }
  0x76   : > { %289 = sbr.rel (%p1514_p0) target bundleno = 808 (0x328), region = 48  ;;  %s758_s17 = sshll.u32 (!%p1514_p0), %s1395_s8, 3 }
  0x77   : > { %s292_s21 = scalar_lea.sflag (!%p1514_p0), [#allocation3], %s1395_s8  ;;  %s295_s16 = scalar_lea.vmem (!%p1514_p0), [#allocation2], %s758_s17 }
  0x7d   : > { %1116 = dma.done.wait (%p1515_p9), %s292_s21, 128  }
  0x7e   : > { %1118 = vsyncadd (%p1515_p9), %s292_s21, 4294967168  ;;  %p1516_p8 = scmp.eq.s32.totalorder %s1217_s28, 0 }
  0x80   : > { %1120 = dma.done.wait (%p1516_p8), [#allocation6], 1280   ;;  %p1517_p11 = pmov %p1516_p8 }
  0x81   : > { %p1518_p13 = pmov %p1516_p8 }
  0x82   : > { %1122 = vsyncadd (%p1517_p11), [#allocation6], 4294966016 }
  0x83   : > { %1124 = dma.done.wait (%p1518_p13), [#allocation9], 1024   ;;  %p1519_p6 = pmov %p1516_p8 }
  0x84   : > { %v1153_v0 = vmov 0.0   ;;  %vm1154_vm0 = vmmov 0   ;;  %v939_v1 = vld [vmem:[#allocation5] sm:$0xff]   ;;  %v940_v2 = vld [vmem:[#allocation5 + $0x8] sm:$0xff]   ;;  %v339_v3 = vld [vmem:[%s295_s16] sm:$0xff]  ;;  %vm364_vm1 = vcmask 261120  }
  0x85   : > { %1126 = vsyncadd (%p1519_p6), [#allocation9], 4294966272  ;;  %810 = vmatprep.subr.bf16.mxu0 %v1153_v0  ;;  %814 = vmatprep.mubr.msk.bf16.mxu0 %vm1154_vm0, %v1153_v0  ;;  %v941_v4 = vld [vmem:[#allocation7] sm:$0xff]   ;;  %v340_v5 = vpack.c.bf16 %v339_v3, %v339_v3  ;;  %v942_v6 = vld [vmem:[#allocation7 + $0x8] sm:$0xff]   ;;  %s762_s11 = sshll.u32 %s1395_s8, 2  ;;  %s786_s20 = sshll.u32 %s1217_s28, 6 }
  0x86   : > { %818 = vmatprep.subr.bf16.mxu1 %v1153_v0  ;;  %834 = vmatprep.mubr.msk.bf16.mxu1 %vm1154_vm0, %v1153_v0  ;;  %v943_v7 = vld [vmem:[#allocation7 + $0x10] sm:$0xff]   ;;  %v944_v8 = vld [vmem:[#allocation7 + $0x18] sm:$0xff]   ;;  %v945_v9 = vld [vmem:[#allocation7 + $0x20] sm:$0xff]   ;;  %s337_s15 = scalar_lea.vmem [#allocation10], %s762_s11  ;;  %s1449_s21 = scalar_lea.hbm %s1500_s7, %s786_s20 }
  0x87   : > { %811 = vmatpush3.bf16.msra.mxu0 %v939_v1  ;;  %819 = vmatpush3.bf16.msra.mxu1 %v941_v4  ;;  %v946_v10 = vld [vmem:[#allocation7 + $0x28] sm:$0xff]   ;;  %v947_v11 = vld [vmem:[#allocation7 + $0x30] sm:$0xff]   ;;  %v948_v12 = vld [vmem:[#allocation7 + $0x38] sm:$0xff]   ;;  %s650_s29 = sshll.u32 %s337_s15, 4  ;;  %s637_s16 = scalar_lea.sflag [#allocation4], %s1395_s8  ;;  %s1451_s29 = int_to_ptr.vmem [resolvable:$true] %s650_s29 }
  0x88   : > { %812 = vmatprep.subr.bf16.mxu0 %v1153_v0  ;;  %820 = vmatprep.subr.bf16.mxu1 %v1153_v0  ;;  %v949_v13 = vld [vmem:[#allocation8] sm:$0xff]   ;;  %v950_v14 = vld [vmem:[#allocation8 + $0x8] sm:$0xff]   ;;  %v951_v15 = vld [vmem:[#allocation8 + $0x10] sm:$0xff]   ;;  %s1071_s28 = scalar_lea.vmem %s1451_s29, 64  ;;  %s1155_s30 = smov [#allocation10]  }
  0x89   : > { %v952_v16 = vld [vmem:[#allocation8 + $0x18] sm:$0xff]   ;;  %v953_v17 = vld [vmem:[#allocation8 + $0x20] sm:$0xff]   ;;  %v954_v18 = vld [vmem:[#allocation8 + $0x28] sm:$0xff]   ;;  %p1072_p10 = scmp.ne.s32.totalorder %s1451_s29, %s1071_s28  ;;  %s1075_s9 = sshll.u32 %s1155_s30, 4  ;;  %s1076_s9 = int_to_ptr.vmem [resolvable:$false] %s1075_s9 }
  0x8a   : > { %v763_v19 = vld [vmem:[%s1495_s2] ss:$0 sm:$0xff]  ;;  %v955_v27 = vld [vmem:[#allocation8 + $0x30] sm:$0xff]   ;;  %v956_v28 = vld [vmem:[#allocation8 + $0x38] sm:$0xff]   ;;  %s1077_s23 = scalar_lea.vmem %s1076_s9, 128  ;;  %p1078_p12 = scmp.lt.s32.totalorder %s1451_s29, %s1076_s9 }
  0x8b   : > { %813 = vmatpush3.bf16.msra.mxu0 %v940_v2  ;;  %821 = vmatpush3.bf16.msra.mxu1 %v942_v6  ;;  %v767_v29 = vld [vmem:[%s1497_s4] ss:$0 sm:$0xff]  ;;  %p1073_p3 = pnand %p1072_p10, %p1350_p5  ;;  %p1079_p1 = scmp.lt.s32.totalorder %s1077_s23, %s1071_s28 }
  0x8c   : > { %838 = vmatprep.subr.bf16.mxu0 %v1153_v0  ;;  %822 = vmatprep.subr.bf16.mxu1 %v1153_v0  ;;  %v776_v37 = vld [vmem:[%s1499_s6] ss:$0 sm:$0xff] }
  0x8d   : > { %p1074_p7 = pneg %p1073_p3  ;;  %p1080_p2 = por %p1079_p1, %p1078_p12 }
  0x8e   : > { %815 = vmatmul.mubr.msk.bf16.vlgmr.msra.gmra.mrb[0].mxu0 %vm364_vm1, %v340_v5 }
  0x8f   : > { %854 = vmatprep.mubr.msk.bf16.mxu0 %vm1154_vm0, %v1153_v0  ;;  %823 = vmatpush3.bf16.msra.mxu1 %v943_v7  ;;  %p1081_p4 = pnand %p1080_p2, %p1074_p7 }
  0x90   : > { %824 = vmatprep.subr.bf16.mxu1 %v1153_v0  ;;  %839 = vmatpush3.bf16.msra.mxu0 %v949_v13 }
  0x91   : > { %840 = vmatprep.subr.bf16.mxu0 %v1153_v0 }
  0x93   : > { %825 = vmatpush3.bf16.msra.mxu1 %v944_v8 }
  0x94   : > { %826 = vmatprep.subr.bf16.mxu1 %v1153_v0  ;;  %841 = vmatpush3.bf16.msra.mxu0 %v950_v14 }
  0x95   : > { %842 = vmatprep.subr.bf16.mxu0 %v1153_v0 }
  0x97   : > { %827 = vmatpush3.bf16.msra.mxu1 %v945_v9 }
  0x98   : > { %828 = vmatprep.subr.bf16.mxu1 %v1153_v0  ;;  %843 = vmatpush3.bf16.msra.mxu0 %v951_v15 }
  0x99   : > { %844 = vmatprep.subr.bf16.mxu0 %v1153_v0 }
  0x9b   : > { %829 = vmatpush3.bf16.msra.mxu1 %v946_v10 }
  0x9c   : > { %830 = vmatprep.subr.bf16.mxu1 %v1153_v0  ;;  %845 = vmatpush3.bf16.msra.mxu0 %v952_v16 }
  0x9d   : > { %846 = vmatprep.subr.bf16.mxu0 %v1153_v0 }
  0x9f   : > { %831 = vmatpush3.bf16.msra.mxu1 %v947_v11 }
  0xa0   : > { %832 = vmatprep.subr.bf16.mxu1 %v1153_v0  ;;  %847 = vmatpush3.bf16.msra.mxu0 %v953_v17 }
  0xa1   : > { %848 = vmatprep.subr.bf16.mxu0 %v1153_v0 }
  0xa3   : > { %833 = vmatpush3.bf16.msra.mxu1 %v948_v12 }
  0xa4   : > { %849 = vmatpush3.bf16.msra.mxu0 %v954_v18 }
  0xa5   : > { %850 = vmatprep.subr.bf16.mxu0 %v1153_v0 }
  0xa8   : > { %851 = vmatpush3.bf16.msra.mxu0 %v955_v27 }
  0xa9   : > { %852 = vmatprep.subr.bf16.mxu0 %v1153_v0 }
  0xac   : > { %853 = vmatpush3.bf16.msra.mxu0 %v956_v28 }
 0x161   : > { %v402_v20 = vpop.f32.mrb[0].mxu0 }
 0x162   : > { %v403_v21 = vadd.f32 %v763_v19, %v402_v20  ;;  %v816_v22 = vpop.f32.mrb[1].mxu0 }
 0x163   : > { %v405_v23 = vpop.f32.mrb[2].mxu0 }
 0x164   : > { %v408_v24 = vmax.f32 %v403_v21, 0.0  ;;  %v817_v25 = vpop.f32.mrb[3].mxu0 }
 0x166   : > { %v409_v26 = vpack.c.bf16 %v408_v24, %v408_v24 }
 0x168   : > { %835 = vmatmul.mubr.bf16.vlgmr.msra.gmra.mrb[0].mxu1 %v409_v26 }
 0x23b   : > { %v515_v30 = vpop.f32.mrb[0].mxu1 }
 0x23c   : > { %v516_v31 = vadd.f32 %v767_v29, %v515_v30  ;;  %v836_v32 = vpop.f32.mrb[1].mxu1 }
 0x23d   : > { %v518_v33 = vpop.f32.mrb[2].mxu1 }
 0x23e   : > { %v521_v34 = vmax.f32 %v516_v31, 0.0  ;;  %v837_v35 = vpop.f32.mrb[3].mxu1 }
 0x240   : > { %v522_v36 = vpack.c.bf16 %v521_v34, %v521_v34 }
 0x242   : > { %855 = vmatmul.mubr.bf16.vlgmr.msra.gmra.mrb[4].mxu0 %v522_v36 }
 0x315   : > { %v628_v38 = vpop.f32.mrb[4].mxu0 }
 0x316   : > { %v629_v39 = vadd.f32 %v776_v37, %v628_v38  ;;  %v856_v40 = vpop.f32.mrb[5].mxu0 }
 0x317   : > { %v631_v41 = vpop.f32.mrb[6].mxu0 }
 0x318   : > { %v634_v42 = vpack.c.bf16 %v629_v39, %v629_v39  ;;  %v857_v43 = vpop.f32.mrb[7].mxu0 }
 0x31a   : > { %635 = vst [vmem:[%s337_s15] sm:$0xf] %v634_v42 }
 0x31b   : > { %1084 = shalt.err (!%p1081_p4)
}
 0x31c   : > { %s1085_s8 = scalar_lea.hbm %s1449_s21, 64  ;;  %s1089_s14 = scalar_lea.hbm %s1500_s7, 128 }
 0x31d   : > { %p1086_p0 = scmp.ne.s32.totalorder %s1449_s21, %s1085_s8  ;;  %p1090_p11 = scmp.lt.u32.totalorder %s1449_s21, %s1500_s7 }
 0x31e   : > { %p1091_p13 = scmp.lt.u32.totalorder %s1089_s14, %s1085_s8  ;;  %p1093_p10 = scmp.lt.u32.totalorder %s1085_s8, %s1449_s21 }
 0x31f   : > { %p1087_p9 = pnand %p1086_p0, %p1350_p5 }
 0x320   : > { %p1092_p6 = por %p1091_p13, %p1090_p11 }
 0x321   : > { %p1088_p8 = pneg %p1087_p9 }
 0x322   : > { %p1094_p3 = por %p1093_p10, %p1092_p6 }
 0x324   : > { %p1095_p7 = pnand %p1094_p3, %p1088_p8 }
 0x326   : > { %1098 = shalt.err (!%p1095_p7)
}
 0x327   : > { %872 = dma.vmem_to_hbm [thread:$0]  (%p1350_p5), %s1451_s29, 64, %s1449_s21, %s637_s16  }
 0x328 PF: > { %s1520_s15 = sld [smem:[#allocation15_spill]]  ;;  %s662_s12 = sand.u32 1, %s1133_s24  }
 0x329   : > { %p1522_p1 = scmp.ge.s32.totalorder %s1145_s27, 2  ;;  %s663_s17 = scalar_lea.sflag [#allocation4], %s662_s12 }
 0x32e   : > { %p1521_p12 = scmp.ne.s32.totalorder %s1520_s15, 0 }
 0x330   : > { %p889_p2 = pnand %p1522_p1, %p1521_p12 }
 0x332   : > { %1128 = dma.done.wait (!%p889_p2), %s663_s17, 64  }
 0x333   : > { %1130 = vsyncadd (!%p889_p2), %s663_s17, 4294967232  ;;  %p22_p4 = scmp.ge.s32.totalorder %s1336_s22, 4   ;;  %s1523_s24 = smov %s1137_s25 }
 0x334   : > { %s1524_s25 = smov %s1141_s26  ;;  %s1525_s26 = smov %s1346_s18 }
 0x335   : > { %s1526_s27 = smov %s1336_s22  ;;  %24 = sbr.rel (!%p22_p4) target bundleno = 7 (0x7), region = 105 }
 0x33c   :  { %668 = vsyncpa [#allocation3], 1 }
 0x33d   :  { %670 = vsyncpa [#allocation3 + $0x1], 1 }
 0x33e   :  { %671 = vsyncpa [#allocation6], 1 }
 0x33f   :  { %672 = vsyncpa [#allocation9], 1 }
 0x340   :  { %673 = vsyncpa [#allocation4], 1 }
 0x341   :  { %675 = vsyncpa [#allocation4 + $0x1], 1 }

</bundles_post_ra>
